<compile_context>
chip_gen: v7x
topology: tpu7x:2x2x1
jax: 0.10.0
libtpu: 0.0.40
codegen_flags: <defaults>
</compile_context>

<pallas_src>
import jax
import jax.numpy as jnp
from jax.experimental import pallas as pl
from jax.experimental.pallas import tpu as pltpu

C_IN = 256
C_OUT = 256


def _conv1d_k1_kernel(x_ref, w_ref, b_ref, o_ref):
    # x_ref: (TILE_M, C_in)   bf16 activation rows (one row = one (n, l) position)
    # w_ref: (C_in, C_out)    bf16 weight, resident across grid steps
    # b_ref: (1, C_out)       f32 bias, lane-dense
    # o_ref: (TILE_M, C_out)  f32 output rows
    acc = jnp.dot(x_ref[...], w_ref[...], preferred_element_type=jnp.float32)
    o_ref[...] = (acc + b_ref[...]).astype(o_ref.dtype)


def conv1d_k1(A, weight, bias, *, tile_m=None, use_bf16=True):
    """kernel_size=1 Conv1d (PyTorch semantics).

    A:      (N, C_in, L) float32, NCL layout
    weight: (C_out, C_in, 1)
    bias:   (C_out,)
    returns (N, C_out, L) float32
    """
    N, C_in, L = A.shape
    C_out = weight.shape[0]
    M = N * L

    # --- layout plumbing (outside the kernel): NCL -> (N*L, C_in) rows ---
    x_rows = jnp.transpose(A, (0, 2, 1)).reshape(M, C_in)
    w_t = weight.reshape(C_out, C_in).T                  # (C_in, C_out)
    b_row = bias.reshape(1, C_out).astype(jnp.float32)   # lane-dense bias

    mxu_dtype = jnp.bfloat16 if use_bf16 else x_rows.dtype
    x_rows = x_rows.astype(mxu_dtype)
    w_t = w_t.astype(mxu_dtype)

    # --- row tile: multiple of 8 sublanes; cap keeps double-buffered in/out tiles
    #     (bf16 in + f32 out) at ~6 MiB, safe for every generation's scoped VMEM. ---
    if tile_m is None:
        tile_m = min(2048, ((M + 7) // 8) * 8)
    tile_m = max(8, (tile_m // 8) * 8)

    m_pad = pl.cdiv(M, tile_m) * tile_m
    if m_pad != M:
        x_rows = jnp.pad(x_rows, ((0, m_pad - M), (0, 0)))

    grid = (m_pad // tile_m,)

    out_rows = pl.pallas_call(
        _conv1d_k1_kernel,
        out_shape=jax.ShapeDtypeStruct((m_pad, C_out), jnp.float32),
        grid_spec=pltpu.PrefetchScalarGridSpec(
            num_scalar_prefetch=0,
            grid=grid,
            in_specs=[
                pl.BlockSpec((tile_m, C_in), lambda i: (i, 0)),
                pl.BlockSpec((C_in, C_out), lambda i: (0, 0)),   # resident weight
                pl.BlockSpec((1, C_out), lambda i: (0, 0)),      # resident bias
            ],
            out_specs=pl.BlockSpec((tile_m, C_out), lambda i: (i, 0)),
        ),
        compiler_params=pltpu.CompilerParams(
            dimension_semantics=("parallel",),
        ),
    )(x_rows, w_t, b_row)

    # back to PyTorch's (N, C_out, L)
    out = out_rows[:M].reshape(N, L, C_out)
    return jnp.transpose(out, (0, 2, 1))


if __name__ == "__main__":
    key = jax.random.PRNGKey(0)
    k_a, k_w, k_b = jax.random.split(key, 3)

    N, L = 2, 16
    # deterministic synthetic parameters (Conv1d(256, 256, kernel_size=1) shapes)
    A = jax.random.normal(k_a, (N, C_IN, L), dtype=jnp.float32)
    weight = jax.random.normal(k_w, (C_OUT, C_IN, 1), dtype=jnp.float32) * 0.02
    bias = jax.random.normal(k_b, (C_OUT,), dtype=jnp.float32) * 0.02

    out = conv1d_k1(A, weight, bias)
    out = jax.block_until_ready(out)

    # reference (same math as torch.nn.Conv1d with kernel_size=1)
    w2d = weight[:, :, 0]
    # apples-to-apples: same bf16 input rounding as the kernel, f32 accumulate
    ref_bf16 = (
        jnp.einsum(
            "oc,ncl->nol",
            w2d.astype(jnp.bfloat16).astype(jnp.float32),
            A.astype(jnp.bfloat16).astype(jnp.float32),
        )
        + bias[None, :, None]
    )
    ref_f32 = jnp.einsum("oc,ncl->nol", w2d, A) + bias[None, :, None]

    assert out.shape == (N, C_OUT, L)
    assert jnp.allclose(out, ref_bf16, atol=2e-3, rtol=2e-3)
    assert jnp.allclose(out, ref_f32, atol=5e-2, rtol=5e-2)

    print("KERNEL_OK")
</pallas_src>

<mosaic_0001>
module attributes {stable_mosaic.version = 11 : i64} {
  func.func @_conv1d_k1_kernel(%arg0: i32, %arg1: memref<32x256xbf16, #tpu.memory_space<vmem>>, %arg2: memref<256x256xbf16, #tpu.memory_space<vmem>>, %arg3: memref<1x256xf32, #tpu.memory_space<vmem>>, %arg4: memref<32x256xf32, #tpu.memory_space<vmem>>) attributes {dimension_semantics = [#tpu.dimension_semantics<parallel>], iteration_bounds = array<i64: 1>, scalar_prefetch = 0 : i64, scratch_operands = 0 : i64, tpu.core_type = #tpu.core_type<tc>, window_params = [{transform_indices = @transform_0, window_bounds = array<i64: 32, 256>}, {pipeline_mode = #tpu.pipeline_mode<synchronous>, transform_indices = @transform_1, window_bounds = array<i64: 256, 256>}, {pipeline_mode = #tpu.pipeline_mode<synchronous>, transform_indices = @transform_2, window_bounds = array<i64: 1, 256>}, {transform_indices = @transform_3, window_bounds = array<i64: 32, 256>}]} {
    %c0 = arith.constant 0 : index
    %c0_0 = arith.constant 0 : index
    %0 = vector.load %arg1[%c0, %c0_0] : memref<32x256xbf16, #tpu.memory_space<vmem>>, vector<32x256xbf16>
    %c0_1 = arith.constant 0 : index
    %c0_2 = arith.constant 0 : index
    %1 = vector.load %arg2[%c0_1, %c0_2] : memref<256x256xbf16, #tpu.memory_space<vmem>>, vector<256x256xbf16>
    %cst = arith.constant dense<0.000000e+00> : vector<32x256xf32>
    %2 = tpu.matmul %0, %1, %cst {dimension_numbers = #tpu.dot_dimension_numbers<[1], [0], [0], [1], [0, 0, 1, 1], [], []>} : vector<32x256xbf16>, vector<256x256xbf16>, vector<32x256xf32> -> vector<32x256xf32>
    %c0_3 = arith.constant 0 : index
    %c0_4 = arith.constant 0 : index
    %3 = vector.load %arg3[%c0_3, %c0_4] : memref<1x256xf32, #tpu.memory_space<vmem>>, vector<1x256xf32>
    %4 = vector.broadcast %3 : vector<1x256xf32> to vector<32x256xf32>
    %5 = arith.addf %2, %4 : vector<32x256xf32>
    %c0_5 = arith.constant 0 : index
    %c0_6 = arith.constant 0 : index
    %6 = vector.load %arg4[%c0_5, %c0_6] : memref<32x256xf32, #tpu.memory_space<vmem>>, vector<32x256xf32>
    tpu.vector_store %arg4[%c0_5, %c0_6], %5 {strides = array<i32>} : memref<32x256xf32, #tpu.memory_space<vmem>>, vector<32x256xf32>,
    return
  }
  func.func @transform_0(%arg0: i32) -> (i32, i32) {
    %c0_i32 = arith.constant 0 : i32
    %c0_i32_0 = arith.constant 0 : i32
    return %arg0, %c0_i32 : i32, i32
  }
  func.func @transform_1(%arg0: i32) -> (i32, i32) {
    %c0_i32 = arith.constant 0 : i32
    %c0_i32_0 = arith.constant 0 : i32
    %c0_i32_1 = arith.constant 0 : i32
    return %c0_i32, %c0_i32_0 : i32, i32
  }
  func.func @transform_2(%arg0: i32) -> (i32, i32) {
    %c0_i32 = arith.constant 0 : i32
    %c0_i32_0 = arith.constant 0 : i32
    %c0_i32_1 = arith.constant 0 : i32
    return %c0_i32, %c0_i32_0 : i32, i32
  }
  func.func @transform_3(%arg0: i32) -> (i32, i32) {
    %c0_i32 = arith.constant 0 : i32
    %c0_i32_0 = arith.constant 0 : i32
    return %arg0, %c0_i32 : i32, i32
  }
}

</mosaic_0001>

<bundles_post_ra>
// kernel: tpu_custom_call.1
= control target key start
LH: loop header
LB: loop body
LE: loop exit
PB: predicated region body
PF: predicated region fallthrough
CT: control target
= control target key end

     0   :  { %8 = vsyncpa [#allocation3], 0  ;;  %s617_s0 = inlined_call_operand.hbm [shape: bf16[32,256], index: 0, kind: input, shape index: {}]   ;;  %s618_s1 = inlined_call_operand.hbm [shape: bf16[256,256], index: 1, kind: input, shape index: {}]   ;;  %s619_s2 = inlined_call_operand.vmem [shape: f32[1,256], index: 2, kind: input, shape index: {}]   ;;  %s620_s3 = inlined_call_operand.hbm [shape: f32[32,256], index: 3, kind: output, shape index: {}]  }
   0x1   :  { %9 = vsyncpa [#allocation6], 0 }
   0x2   :  { %10 = vsyncpa [#allocation4], 0  ;;  %s551_s12 = smov [#allocation2]   ;;  %s479_s16 = scalar_lea.hbm %s617_s0, 512 }
   0x3   :  { %s16_s13 = sshll.u32 %s551_s12, 4  ;;  %p480_p0 = scmp.ne.s32.totalorder %s617_s0, %s479_s16  ;;  %s17_s13 = int_to_ptr.vmem [resolvable:$true] %s16_s13 }
   0x4   :  { %p483_p1 = scmp.lt.u32.totalorder %s479_s16, %s617_s0 }
   0x6   :  { %p485_p2 = pnand %p483_p1, %p480_p0 }
   0x8   :  { %488 = shalt.err (!%p485_p2)
}
   0x9   :  { %s489_s21 = scalar_lea.vmem %s17_s13, 512  ;;  %p494_p4 = scmp.lt.s32.totalorder %s17_s13, %s17_s13 }
   0xa   :  { %p490_p3 = scmp.ne.s32.totalorder %s17_s13, %s489_s21  ;;  %p495_p5 = scmp.lt.s32.totalorder %s489_s21, %s489_s21 }
   0xc   :  { %p496_p6 = por %p495_p5, %p494_p4 }
   0xe   :  { %p497_p7 = pnand %p496_p6, %p490_p3 }
  0x10   :  { %500 = shalt.err (!%p497_p7)
}
  0x11   :  { %s552_s22 = smov 128   ;;  %s553_s23 = smov 8  }
  0x12   :  { %22 = dma.hbm_to_vmem [thread:$0]  %s617_s0, 512, %s17_s13, [#allocation3], %s552_s22, %s552_s22, %s553_s23  }
  0x13   :  { %s554_s26 = smov [#allocation5]   ;;  %s501_s30 = scalar_lea.hbm %s618_s1, 4096 }
  0x14   :  { %s28_s27 = sshll.u32 %s554_s26, 4  ;;  %p502_p8 = scmp.ne.s32.totalorder %s618_s1, %s501_s30  ;;  %s29_s27 = int_to_ptr.vmem [resolvable:$true] %s28_s27 }
  0x15   :  { %p505_p9 = scmp.lt.u32.totalorder %s501_s30, %s618_s1 }
  0x17   :  { %p507_p10 = pnand %p505_p9, %p502_p8 }
  0x19   :  { %510 = shalt.err (!%p507_p10)
}
  0x1a   :  { %s511_s8 = scalar_lea.vmem %s29_s27, 4096  ;;  %p516_p12 = scmp.lt.s32.totalorder %s29_s27, %s29_s27 }
  0x1b   :  { %p512_p11 = scmp.ne.s32.totalorder %s29_s27, %s511_s8  ;;  %p517_p13 = scmp.lt.s32.totalorder %s511_s8, %s511_s8 }
  0x1d   :  { %p518_p0 = por %p517_p13, %p516_p12 }
  0x1f   :  { %p519_p1 = pnand %p518_p0, %p512_p11 }
  0x21   :  { %522 = shalt.err (!%p519_p1)
}
  0x22   :  { %34 = dma.hbm_to_vmem [thread:$0]  %s618_s1, 4096, %s29_s27, [#allocation6], %s552_s22, %s552_s22, %s553_s23  }
  0x23   :  { %545 = dma.done.wait [#allocation3], 512  }
  0x24   :  { %546 = vsyncadd [#allocation3], 4294966784 }
  0x25   :  { %547 = dma.done.wait [#allocation6], 4096  }
  0x26   :  { %548 = vsyncadd [#allocation6], 4294963200  ;;  %v425_v0 = vld [vmem:[#allocation5 + $0x4] ss:$8 sps:$4 sm:$0xff]   ;;  %v427_v1 = vld [vmem:[#allocation5] ss:$8 sps:$4 sm:$0xff]   ;;  %v81_v36 = vlaneseq }
  0x27   :  { %271 = vmatprep.subr.bf16.mxu0 %v425_v0  ;;  %386 = vmatprep.subr.bf16.mxu1 %v425_v0  ;;  %v428_v2 = vld [vmem:[#allocation5 + $0x14] ss:$8 sps:$4 sm:$0xff]   ;;  %v430_v3 = vld [vmem:[#allocation5 + $0x10] ss:$8 sps:$4 sm:$0xff]   ;;  %v431_v4 = vld [vmem:[#allocation5 + $0x24] ss:$8 sps:$4 sm:$0xff]  }
  0x28   :  { %272 = vmatpush1.bf16.msra.mxu0 %v427_v1  ;;  %402 = vmatpush1.bf16.msra.mxu1 %v427_v1  ;;  %v433_v5 = vld [vmem:[#allocation5 + $0x20] ss:$8 sps:$4 sm:$0xff]   ;;  %v434_v6 = vld [vmem:[#allocation5 + $0x34] ss:$8 sps:$4 sm:$0xff]   ;;  %v436_v7 = vld [vmem:[#allocation5 + $0x30] ss:$8 sps:$4 sm:$0xff]  }
  0x29   :  { %273 = vmatprep.subr.bf16.mxu0 %v428_v2  ;;  %387 = vmatprep.subr.bf16.mxu1 %v428_v2  ;;  %v437_v8 = vld [vmem:[#allocation5 + $0x44] ss:$8 sps:$4 sm:$0xff]   ;;  %v439_v9 = vld [vmem:[#allocation5 + $0x40] ss:$8 sps:$4 sm:$0xff]   ;;  %v440_v10 = vld [vmem:[#allocation5 + $0x54] ss:$8 sps:$4 sm:$0xff]  }
  0x2a   :  { %v442_v11 = vld [vmem:[#allocation5 + $0x50] ss:$8 sps:$4 sm:$0xff]   ;;  %v443_v12 = vld [vmem:[#allocation5 + $0x64] ss:$8 sps:$4 sm:$0xff]   ;;  %v445_v14 = vld [vmem:[#allocation5 + $0x60] ss:$8 sps:$4 sm:$0xff]  }
  0x2b   :  { %v475_v13 = vld [vmem:[#allocation2 + $0x4] ss:$8 sps:$4 sm:$0xff]   ;;  %v478_v15 = vld [vmem:[#allocation2 + $0x14] ss:$8 sps:$4 sm:$0xff]   ;;  %v448_v17 = vld [vmem:[#allocation5 + $0x70] ss:$8 sps:$4 sm:$0xff]  }
  0x2c   :  { %274 = vmatpush1.bf16.msra.mxu0 %v430_v3  ;;  %403 = vmatpush1.bf16.msra.mxu1 %v430_v3  ;;  %v446_v16 = vld [vmem:[#allocation5 + $0x74] ss:$8 sps:$4 sm:$0xff]   ;;  %v449_v18 = vld [vmem:[#allocation5 + $0x84] ss:$8 sps:$4 sm:$0xff]   ;;  %v451_v19 = vld [vmem:[#allocation5 + $0x80] ss:$8 sps:$4 sm:$0xff]  }
  0x2d   :  { %275 = vmatprep.subr.bf16.mxu0 %v431_v4  ;;  %388 = vmatprep.subr.bf16.mxu1 %v431_v4  ;;  %v452_v20 = vld [vmem:[#allocation5 + $0x94] ss:$8 sps:$4 sm:$0xff]   ;;  %v454_v21 = vld [vmem:[#allocation5 + $0x90] ss:$8 sps:$4 sm:$0xff]   ;;  %v455_v22 = vld [vmem:[#allocation5 + $0xa4] ss:$8 sps:$4 sm:$0xff]  }
  0x2e   :  { %303 = vmatprep.mubr.bf16.mxu0 %v475_v13  ;;  %313 = vmatprep.mubr.bf16.mxu1 %v478_v15  ;;  %v457_v23 = vld [vmem:[#allocation5 + $0xa0] ss:$8 sps:$4 sm:$0xff]   ;;  %v458_v24 = vld [vmem:[#allocation5 + $0xb4] ss:$8 sps:$4 sm:$0xff]   ;;  %v460_v25 = vld [vmem:[#allocation5 + $0xb0] ss:$8 sps:$4 sm:$0xff]  }
  0x2f   :  { %v461_v26 = vld [vmem:[#allocation5 + $0xc4] ss:$8 sps:$4 sm:$0xff]   ;;  %v463_v27 = vld [vmem:[#allocation5 + $0xc0] ss:$8 sps:$4 sm:$0xff]   ;;  %v464_v28 = vld [vmem:[#allocation5 + $0xd4] ss:$8 sps:$4 sm:$0xff]  }
  0x30   :  { %276 = vmatpush1.bf16.msra.mxu0 %v433_v5  ;;  %404 = vmatpush1.bf16.msra.mxu1 %v433_v5  ;;  %v466_v29 = vld [vmem:[#allocation5 + $0xd0] ss:$8 sps:$4 sm:$0xff]   ;;  %v467_v30 = vld [vmem:[#allocation5 + $0xe4] ss:$8 sps:$4 sm:$0xff]   ;;  %v469_v31 = vld [vmem:[#allocation5 + $0xe0] ss:$8 sps:$4 sm:$0xff]  }
  0x31   :  { %277 = vmatprep.subr.bf16.mxu0 %v434_v6  ;;  %389 = vmatprep.subr.bf16.mxu1 %v434_v6  ;;  %v470_v32 = vld [vmem:[#allocation5 + $0xf4] ss:$8 sps:$4 sm:$0xff]   ;;  %v472_v33 = vld [vmem:[#allocation5 + $0xf0] ss:$8 sps:$4 sm:$0xff]   ;;  %v473_v34 = vld [vmem:[#allocation2] ss:$8 sps:$4 sm:$0xff]  }
  0x32   :  { %v476_v35 = vld [vmem:[#allocation2 + $0x10] ss:$8 sps:$4 sm:$0xff]   ;;  %v82_v37 = vshrl.u32 %v81_v36, 7  ;;  %v79_v39 = vld [vmem:[%s619_s2] sm:$0x3]  ;;  %s555_s11 = smov [#allocation7]  }
  0x33   :  { %s337_s12 = sshll.u32 %s555_s11, 4  ;;  %s338_s12 = int_to_ptr.vmem [resolvable:$true] %s337_s12 }
  0x34   :  { %278 = vmatpush1.bf16.msra.mxu0 %v436_v7  ;;  %405 = vmatpush1.bf16.msra.mxu1 %v436_v7  ;;  %v83_v38 = vsub.s32 0, %v82_v37  ;;  %v87_v40 = vsub.s32 1, %v82_v37  ;;  %s523_s2 = scalar_lea.vmem %s338_s12, 1024  ;;  %p528_p3 = scmp.lt.s32.totalorder %s338_s12, %s338_s12 }
  0x35   :  { %279 = vmatprep.subr.bf16.mxu0 %v437_v8  ;;  %390 = vmatprep.subr.bf16.mxu1 %v437_v8  ;;  %p524_p2 = scmp.ne.s32.totalorder %s338_s12, %s523_s2  ;;  %p529_p4 = scmp.lt.s32.totalorder %s523_s2, %s523_s2 }
  0x36   :  { %v84_v41 = vrot.slane %v79_v39, %v83_v38  ;;  %v88_v42 = vrot.slane %v79_v39, %v87_v40 }
  0x37   :  { %p530_p5 = por %p529_p4, %p528_p3 }
  0x38   :  { %280 = vmatpush1.bf16.msra.mxu0 %v439_v9  ;;  %406 = vmatpush1.bf16.msra.mxu1 %v439_v9 }
  0x39   :  { %281 = vmatprep.subr.bf16.mxu0 %v440_v10  ;;  %391 = vmatprep.subr.bf16.mxu1 %v440_v10  ;;  %p531_p6 = pnand %p530_p5, %p524_p2 }
  0x3c   :  { %282 = vmatpush1.bf16.msra.mxu0 %v442_v11  ;;  %407 = vmatpush1.bf16.msra.mxu1 %v442_v11 }
  0x3d   :  { %283 = vmatprep.subr.bf16.mxu0 %v443_v12  ;;  %392 = vmatprep.subr.bf16.mxu1 %v443_v12 }
  0x40   :  { %284 = vmatpush1.bf16.msra.mxu0 %v445_v14  ;;  %408 = vmatpush1.bf16.msra.mxu1 %v445_v14 }
  0x41   :  { %285 = vmatprep.subr.bf16.mxu0 %v446_v16  ;;  %393 = vmatprep.subr.bf16.mxu1 %v446_v16 }
  0x44   :  { %286 = vmatpush1.bf16.msra.mxu0 %v448_v17  ;;  %409 = vmatpush1.bf16.msra.mxu1 %v448_v17 }
  0x45   :  { %287 = vmatprep.subr.bf16.mxu0 %v449_v18  ;;  %394 = vmatprep.subr.bf16.mxu1 %v449_v18 }
  0x48   :  { %288 = vmatpush1.bf16.msra.mxu0 %v451_v19  ;;  %410 = vmatpush1.bf16.msra.mxu1 %v451_v19 }
  0x49   :  { %289 = vmatprep.subr.bf16.mxu0 %v452_v20  ;;  %395 = vmatprep.subr.bf16.mxu1 %v452_v20 }
  0x4c   :  { %290 = vmatpush1.bf16.msra.mxu0 %v454_v21  ;;  %411 = vmatpush1.bf16.msra.mxu1 %v454_v21 }
  0x4d   :  { %291 = vmatprep.subr.bf16.mxu0 %v455_v22  ;;  %396 = vmatprep.subr.bf16.mxu1 %v455_v22 }
  0x50   :  { %292 = vmatpush1.bf16.msra.mxu0 %v457_v23  ;;  %412 = vmatpush1.bf16.msra.mxu1 %v457_v23 }
  0x51   :  { %293 = vmatprep.subr.bf16.mxu0 %v458_v24  ;;  %397 = vmatprep.subr.bf16.mxu1 %v458_v24 }
  0x54   :  { %294 = vmatpush1.bf16.msra.mxu0 %v460_v25  ;;  %413 = vmatpush1.bf16.msra.mxu1 %v460_v25 }
  0x55   :  { %295 = vmatprep.subr.bf16.mxu0 %v461_v26  ;;  %398 = vmatprep.subr.bf16.mxu1 %v461_v26 }
  0x58   :  { %296 = vmatpush1.bf16.msra.mxu0 %v463_v27  ;;  %414 = vmatpush1.bf16.msra.mxu1 %v463_v27 }
  0x59   :  { %297 = vmatprep.subr.bf16.mxu0 %v464_v28  ;;  %399 = vmatprep.subr.bf16.mxu1 %v464_v28 }
  0x5c   :  { %298 = vmatpush1.bf16.msra.mxu0 %v466_v29  ;;  %415 = vmatpush1.bf16.msra.mxu1 %v466_v29 }
  0x5d   :  { %299 = vmatprep.subr.bf16.mxu0 %v467_v30  ;;  %400 = vmatprep.subr.bf16.mxu1 %v467_v30 }
  0x60   :  { %300 = vmatpush1.bf16.msra.mxu0 %v469_v31  ;;  %416 = vmatpush1.bf16.msra.mxu1 %v469_v31 }
  0x61   :  { %301 = vmatprep.subr.bf16.mxu0 %v470_v32  ;;  %401 = vmatprep.subr.bf16.mxu1 %v470_v32 }
  0x64   :  { %302 = vmatpush1.bf16.msra.mxu0 %v472_v33  ;;  %417 = vmatpush1.bf16.msra.mxu1 %v472_v33 }
  0x67   :  { %304 = vmatmul.mubr.bf16.vlgmr.msra.gmra.mrb[0].mxu0 %v473_v34  ;;  %314 = vmatmul.mubr.bf16.vlgmr.msra.gmra.mrb[0].mxu1 %v476_v35 }
 0x13a   :  { %v305_v43 = vpop.f32.mrb[0].mxu0  ;;  %v315_v44 = vpop.f32.mrb[0].mxu1 }
 0x13b   :  { %v306_v45 = vadd.f32 %v305_v43, %v84_v41  ;;  %v316_v46 = vadd.f32 %v315_v44, %v84_v41  ;;  %v307_v47 = vpop.f32.mrb[1].mxu0  ;;  %v317_v48 = vpop.f32.mrb[1].mxu1 }
 0x13c   :  { %v308_v49 = vadd.f32 %v307_v47, %v88_v42  ;;  %v318_v50 = vadd.f32 %v317_v48, %v88_v42  ;;  %v309_v51 = vpop.f32.mrb[2].mxu0  ;;  %v319_v52 = vpop.f32.mrb[2].mxu1 }
 0x13d   :  { %324 = vst [vmem:[#allocation7] sm:$0xff] %v306_v45  ;;  %328 = vst [vmem:[#allocation7 + $0x20] sm:$0xff] %v316_v46  ;;  %v310_v53 = vadd.f32 %v309_v51, %v84_v41  ;;  %v320_v54 = vadd.f32 %v319_v52, %v84_v41  ;;  %v311_v55 = vpop.f32.mrb[3].mxu0  ;;  %v321_v56 = vpop.f32.mrb[3].mxu1 }
 0x13e   :  { %325 = vst [vmem:[#allocation7 + $0x8] sm:$0xff] %v308_v49  ;;  %329 = vst [vmem:[#allocation7 + $0x28] sm:$0xff] %v318_v50  ;;  %v312_v57 = vadd.f32 %v311_v55, %v88_v42  ;;  %v322_v58 = vadd.f32 %v321_v56, %v88_v42 }
 0x13f   :  { %326 = vst [vmem:[#allocation7 + $0x10] sm:$0xff] %v310_v53  ;;  %330 = vst [vmem:[#allocation7 + $0x30] sm:$0xff] %v320_v54 }
 0x140   :  { %327 = vst [vmem:[#allocation7 + $0x18] sm:$0xff] %v312_v57  ;;  %331 = vst [vmem:[#allocation7 + $0x38] sm:$0xff] %v322_v58 }
 0x141   :  { %534 = shalt.err (!%p531_p6)
}
 0x142   :  { %s535_s15 = scalar_lea.hbm %s620_s3, 1024 }
 0x143   :  { %p536_p7 = scmp.ne.s32.totalorder %s620_s3, %s535_s15  ;;  %p539_p8 = scmp.lt.u32.totalorder %s535_s15, %s620_s3 }
 0x145   :  { %p541_p9 = pnand %p539_p8, %p536_p7 }
 0x147   :  { %544 = shalt.err (!%p541_p9)
}
 0x148   :  { %s556_s20 = smov 256   ;;  %s557_s21 = smov 16  }
 0x149   :  { %343 = dma.vmem_to_hbm [thread:$0]  %s338_s12, 1024, %s620_s3, [#allocation4], %s556_s20, %s556_s20, %s557_s21  }
 0x14a   :  { %549 = dma.done.wait [#allocation4], 1024  }
 0x14b   :  { %550 = vsyncadd [#allocation4], 4294966272 }
 0x14c   :  { %347 = vsyncpa [#allocation3], 1 }
 0x14d   :  { %348 = vsyncpa [#allocation6], 1 }
 0x14e   :  { %349 = vsyncpa [#allocation4], 1 }

</bundles_post_ra>
